<compile_context>
chip_gen: v7x
topology: tpu7x:2x2x1
jax: 0.10.0
libtpu: 0.0.40
codegen_flags: <defaults>
</compile_context>

<pallas_src>
import functools

import jax
import jax.numpy as jnp
from jax.experimental import pallas as pl
from jax.experimental.pallas import tpu as pltpu

MIB = 1024 * 1024


# ---------------------------------------------------------------------------
# helpers
# ---------------------------------------------------------------------------
def round_up(x, m):
    return ((x + m - 1) // m) * m


def pad2d(x, rows, cols):
    r, c = x.shape
    return jnp.pad(x, ((0, rows - r), (0, cols - c)))


def _tpu_vmem_bytes():
    """Physical VMEM per core; conservative fallback if the query is unavailable."""
    try:
        return int(pltpu.get_tpu_info().vmem_capacity_bytes)
    except Exception:
        return 64 * MIB  # v7x-sized conservative default


def _vmem_limit_bytes():
    # ~48 MiB on v7x (64 MiB physical), ~100 MiB on v5e/v6e (128 MiB physical).
    return min(_tpu_vmem_bytes() - 16 * MIB, 100 * MIB)


# ---------------------------------------------------------------------------
# Fused whole-model kernel (small-N regime: adj, all W/b and H live in VMEM)
# ---------------------------------------------------------------------------
def _make_fused_kernel(n_layers):
    def kernel(adj_ref, x_ref, *rest):
        o_ref = rest[-1]
        wb = rest[:-1]                    # w0, b0, w1, b1, ...
        adj = adj_ref[...]                # bf16, resident for all layers
        h = x_ref[...]                    # bf16 inter-layer activations stay bf16
        for li in range(n_layers):
            w_ref = wb[2 * li]
            b_ref = wb[2 * li + 1]
            xw = jnp.dot(h, w_ref[...], preferred_element_type=jnp.float32)
            agg = jnp.dot(adj, xw.astype(jnp.bfloat16),
                          preferred_element_type=jnp.float32) + b_ref[...]
            if li == n_layers - 1:
                o_ref[...] = agg.astype(o_ref.dtype)     # final layer -> straight to out
            else:
                h = jnp.maximum(agg, 0.0).astype(jnp.bfloat16)
    return kernel


def gcn_model_forward_fused(fea, adj, params, *, vmem_limit_bytes=None):
    n = adj.shape[0]
    n_p = round_up(n, 128)
    n_layers = len(params)
    nclass = params[-1][0].shape[1]
    nclass_p = round_up(nclass, 128)

    # TODO(synk): for repeated inference, hoist this pad+bf16 cast of the N^2
    # adjacency out of the per-forward path (prepare once, reuse).
    adj_p = pad2d(adj, n_p, n_p).astype(jnp.bfloat16)
    f0_p = round_up(fea.shape[1], 128)
    x_p = pad2d(fea, n_p, f0_p).astype(jnp.bfloat16)

    layer_inputs = []
    in_specs = [
        pl.BlockSpec((n_p, n_p), lambda i: (0, 0)),
        pl.BlockSpec((n_p, f0_p), lambda i: (0, 0)),
    ]
    # Per-layer padding: each W/b gets its own ref and its own padded width, so the
    # input layer (nfeat->nhid) and the head (nhid->nclass) don't inflate to max(dim).
    for (w, b) in params:
        f_in_p = round_up(w.shape[0], 128)
        f_out_p = round_up(w.shape[1], 128)
        layer_inputs.append(pad2d(w, f_in_p, f_out_p).astype(jnp.bfloat16))
        layer_inputs.append(
            jnp.pad(b, (0, f_out_p - b.shape[0])).astype(jnp.float32)[None, :])
        in_specs.append(pl.BlockSpec((f_in_p, f_out_p), lambda i: (0, 0)))
        in_specs.append(pl.BlockSpec((1, f_out_p), lambda i: (0, 0)))

    if vmem_limit_bytes is None:
        vmem_limit_bytes = _vmem_limit_bytes()

    out_p = pl.pallas_call(
        _make_fused_kernel(n_layers),
        out_shape=jax.ShapeDtypeStruct((n_p, nclass_p), jnp.float32),
        grid=(1,),
        in_specs=in_specs,
        out_specs=pl.BlockSpec((n_p, nclass_p), lambda i: (0, 0)),
        compiler_params=pltpu.CompilerParams(
            dimension_semantics=("arbitrary",),
            vmem_limit_bytes=vmem_limit_bytes,
        ),
    )(adj_p, x_p, *layer_inputs)

    return out_p[:n, :nclass]


# ---------------------------------------------------------------------------
# Tiled per-layer path (large-N regime).
# One kernel per layer: the feature transform H_k @ W is fused into the
# aggregation (no separate X@W kernel, no XW HBM stream).
# ---------------------------------------------------------------------------
def _layer_kernel(adj_ref, h_ref, w_ref, b_ref, o_ref, acc_ref, *, apply_relu):
    k = pl.program_id(1)

    @pl.when(k == 0)
    def _():
        acc_ref[...] = jnp.zeros_like(acc_ref)

    # Recomputing H_k @ W per row tile costs only MXU slack (kernel is HBM-bound)
    # and removes a whole per-layer HBM stream + kernel launch.
    xw = jnp.dot(h_ref[...], w_ref[...], preferred_element_type=jnp.float32)
    acc_ref[...] += jnp.dot(adj_ref[...], xw.astype(jnp.bfloat16),
                            preferred_element_type=jnp.float32)

    @pl.when(k == pl.num_programs(1) - 1)
    def _():
        h = acc_ref[...] + b_ref[...]
        if apply_relu:
            h = jnp.maximum(h, 0.0)
        o_ref[...] = h.astype(o_ref.dtype)


def _gcn_layer_tiled(adj_bf, h_bf, w, b, *, apply_relu, row_tile, k_tile,
                     out_dtype, vmem_limit_bytes):
    n_p = adj_bf.shape[0]
    f_in, f_out = w.shape
    f_in_p, f_out_p = round_up(f_in, 128), round_up(f_out, 128)
    w_p = pad2d(w, f_in_p, f_out_p).astype(jnp.bfloat16)
    b_p = jnp.pad(b, (0, f_out_p - f_out)).astype(jnp.float32)[None, :]
    assert h_bf.shape == (n_p, f_in_p), (h_bf.shape, n_p, f_in_p)

    kernel = functools.partial(_layer_kernel, apply_relu=apply_relu)
    return pl.pallas_call(
        kernel,
        out_shape=jax.ShapeDtypeStruct((n_p, f_out_p), out_dtype),
        grid=(n_p // row_tile, n_p // k_tile),
        in_specs=[
            pl.BlockSpec((row_tile, k_tile), lambda i, k: (i, k)),   # adj tile
            pl.BlockSpec((k_tile, f_in_p), lambda i, k: (k, 0)),     # H k-strip
            pl.BlockSpec((f_in_p, f_out_p), lambda i, k: (0, 0)),    # W (resident)
            pl.BlockSpec((1, f_out_p), lambda i, k: (0, 0)),         # bias
        ],
        out_specs=pl.BlockSpec((row_tile, f_out_p), lambda i, k: (i, 0)),
        scratch_shapes=[pltpu.VMEM((row_tile, f_out_p), jnp.float32)],
        compiler_params=pltpu.CompilerParams(
            dimension_semantics=("parallel", "arbitrary"),
            vmem_limit_bytes=vmem_limit_bytes,
        ),
    )(adj_bf, h_bf, w_p, b_p)


# Measured HBM-roofline fraction vs tile size (per-step overhead amortization).
_TILE_EFF = {128: 0.30, 256: 0.63, 384: 0.75, 512: 0.85}


def _tile_eff(t):
    return _TILE_EFF.get(t, 0.86)


def _plan_tiling(n, max_tile):
    """Pick (padded N, tile).  Pad N only modestly (multiples of 128) -- padding to a
    huge tile multiple is quadratic waste on the adjacency -- while preferring the
    largest tile that divides padded N (big DMA blocks amortize per-step overhead)."""
    assert max_tile >= 128 and max_tile % 128 == 0
    base = round_up(n, 128)
    best = None
    for n_p in range(base, base + 4 * 128 + 1, 128):
        divisors = [d for d in range(128, min(max_tile, n_p) + 1, 128) if n_p % d == 0]
        t = max(divisors)
        eff = (n * n) / (n_p * n_p) * _tile_eff(t)
        if best is None or eff > best[0]:
            best = (eff, n_p, t)
    return best[1], best[2]


def gcn_model_forward_tiled(fea, adj, params, *, max_tile=1024, vmem_limit_bytes=None):
    n = adj.shape[0]
    n_p, tile = _plan_tiling(n, max_tile)
    if vmem_limit_bytes is None:
        vmem_limit_bytes = _vmem_limit_bytes()

    # TODO(synk): hoist this pad+bf16 cast (and optionally fp8/int8 adjacency
    # quantization) out of the per-forward path for repeated inference.
    adj_bf = pad2d(adj, n_p, n_p).astype(jnp.bfloat16)
    f0_p = round_up(fea.shape[1], 128)
    h = pad2d(fea, n_p, f0_p).astype(jnp.bfloat16)

    n_layers = len(params)
    for li, (w, b) in enumerate(params):
        is_last = li == n_layers - 1
        h = _gcn_layer_tiled(
            adj_bf, h, w, b,
            apply_relu=not is_last,
            row_tile=tile, k_tile=tile,
            out_dtype=jnp.float32 if is_last else jnp.bfloat16,
            vmem_limit_bytes=vmem_limit_bytes)

    nclass = params[-1][0].shape[1]
    return h[:n, :nclass]


# ---------------------------------------------------------------------------
# Dispatcher: fuse the whole stack when it fits VMEM (adjacency read from HBM
# exactly once), otherwise tile per layer.
# ---------------------------------------------------------------------------
def gcn_model_forward(fea, adj, params, *, max_tile=1024):
    n = adj.shape[0]
    n_p = round_up(n, 128)
    vmem_cap = _tpu_vmem_bytes()
    vmem_limit = _vmem_limit_bytes()

    f0_p = round_up(fea.shape[1], 128)
    nclass_p = round_up(params[-1][0].shape[1], 128)
    widths = [round_up(w.shape[1], 128) for (w, _) in params]
    max_w_p = max([f0_p] + widths)

    adj_b = n_p * n_p * 2
    x_b = n_p * f0_p * 2
    w_b = sum(round_up(w.shape[0], 128) * round_up(w.shape[1], 128) * 2 +
              round_up(w.shape[1], 128) * 4 for (w, _) in params)
    out_b = n_p * nclass_p * 4
    inter_b = n_p * max_w_p * 10          # live bf16 H + f32 matmul intermediates
    # Pallas double-buffers every pipelined block (even for grid=(1,)): count 2x.
    fused_bytes = 2 * (adj_b + x_b + w_b + out_b) + inter_b

    # On 64 MiB-VMEM chips (v7x, 2 TensorCores) prefer the tiled path for larger
    # graphs so the 'parallel' row axis shards across both cores.
    prefer_tiled = vmem_cap <= 96 * MIB and n_p >= 2048

    if fused_bytes <= vmem_limit and not prefer_tiled:
        return gcn_model_forward_fused(fea, adj, params, vmem_limit_bytes=vmem_limit)
    return gcn_model_forward_tiled(fea, adj, params, max_tile=max_tile,
                                   vmem_limit_bytes=vmem_limit)


# ---------------------------------------------------------------------------
# Parameters / reference / test data
# ---------------------------------------------------------------------------
def glorot(key, shape):
    fan_in, fan_out = shape
    limit = jnp.sqrt(6.0 / (fan_in + fan_out))
    return jax.random.uniform(key, shape, jnp.float32, -limit, limit)


def init_gcn_params(key, nfeat, nhid, nclass, nbaselayer):
    """Input layer nfeat->nhid, nbaselayer hidden layers nhid->nhid, output nhid->nclass."""
    dims = [nfeat] + [nhid] * (nbaselayer + 1) + [nclass]
    params = []
    for i in range(len(dims) - 1):
        key, wk, bk = jax.random.split(key, 3)
        w = glorot(wk, (dims[i], dims[i + 1]))
        b = 0.05 * jax.random.normal(bk, (dims[i + 1],), jnp.float32)
        params.append((w, b))
    return params


def reference_forward(fea, adj, params):
    """Pure-JAX reference with the same bf16-input / f32-accumulate numerics."""
    adj_bf = adj.astype(jnp.bfloat16)
    h = fea.astype(jnp.float32)
    n_layers = len(params)
    for li, (w, b) in enumerate(params):
        xw = jnp.dot(h.astype(jnp.bfloat16), w.astype(jnp.bfloat16),
                     preferred_element_type=jnp.float32)
        h = jnp.dot(adj_bf, xw.astype(jnp.bfloat16),
                    preferred_element_type=jnp.float32) + b[None, :]
        if li != n_layers - 1:
            h = jnp.maximum(h, 0.0)
    return h


def build_normalized_adj(key, n):
    """A_hat = D^-1/2 (A + I) D^-1/2 with a deterministic random symmetric A."""
    r = jax.random.uniform(key, (n, n), jnp.float32)
    a = (r + r.T > 1.7).astype(jnp.float32)
    a = a + jnp.eye(n, dtype=jnp.float32)
    deg = jnp.sum(a, axis=1)
    d_inv_sqrt = 1.0 / jnp.sqrt(deg)
    return a * d_inv_sqrt[:, None] * d_inv_sqrt[None, :]


if __name__ == "__main__":
    key = jax.random.PRNGKey(0)
    k_adj, k_fea, k_par, k_adj2, k_fea2, k_adj3, k_fea3 = jax.random.split(key, 7)

    NFEAT, NHID, NCLASS, NBASELAYER = 16, 32, 8, 2
    params = init_gcn_params(k_par, NFEAT, NHID, NCLASS, NBASELAYER)

    # --- small graph: dispatcher picks the fully fused single-kernel path ----
    N = 128
    adj = build_normalized_adj(k_adj, N)
    fea = jax.random.normal(k_fea, (N, NFEAT), jnp.float32)
    out = jax.block_until_ready(gcn_model_forward(fea, adj, params))
    ref = reference_forward(fea, adj, params)
    assert out.shape == (N, NCLASS), out.shape
    assert jnp.allclose(out, ref, rtol=2e-2, atol=2e-2), "fused path mismatch vs reference"

    # --- non-multiple-of-128 graph: per-layer tiled path (padding, single tile)
    N2 = 200
    adj2 = build_normalized_adj(k_adj2, N2)
    fea2 = jax.random.normal(k_fea2, (N2, NFEAT), jnp.float32)
    out2 = jax.block_until_ready(gcn_model_forward_tiled(fea2, adj2, params))
    ref2 = reference_forward(fea2, adj2, params)
    assert out2.shape == (N2, NCLASS), out2.shape
    assert jnp.allclose(out2, ref2, rtol=2e-2, atol=2e-2), "tiled path mismatch vs reference"

    # --- multi-tile grid: force 128 tiles so the (row, k) grid + accumulator run
    N3 = 300
    adj3 = build_normalized_adj(k_adj3, N3)
    fea3 = jax.random.normal(k_fea3, (N3, NFEAT), jnp.float32)
    out3 = jax.block_until_ready(gcn_model_forward_tiled(fea3, adj3, params, max_tile=128))
    ref3 = reference_forward(fea3, adj3, params)
    assert out3.shape == (N3, NCLASS), out3.shape
    assert jnp.allclose(out3, ref3, rtol=2e-2, atol=2e-2), "multi-tile path mismatch vs reference"

    print("KERNEL_OK")
</pallas_src>

<mosaic_0001>
module attributes {stable_mosaic.version = 11 : i64} {
  func.func @kernel(%arg0: i32, %arg1: memref<128x128xbf16, #tpu.memory_space<vmem>>, %arg2: memref<128x128xbf16, #tpu.memory_space<vmem>>, %arg3: memref<128x128xbf16, #tpu.memory_space<vmem>>, %arg4: memref<1x128xf32, #tpu.memory_space<vmem>>, %arg5: memref<128x128xbf16, #tpu.memory_space<vmem>>, %arg6: memref<1x128xf32, #tpu.memory_space<vmem>>, %arg7: memref<128x128xbf16, #tpu.memory_space<vmem>>, %arg8: memref<1x128xf32, #tpu.memory_space<vmem>>, %arg9: memref<128x128xbf16, #tpu.memory_space<vmem>>, %arg10: memref<1x128xf32, #tpu.memory_space<vmem>>, %arg11: memref<128x128xf32, #tpu.memory_space<vmem>>) attributes {dimension_semantics = [#tpu.dimension_semantics<arbitrary>], iteration_bounds = array<i64: 1>, scalar_prefetch = 0 : i64, scratch_operands = 0 : i64, tpu.core_type = #tpu.core_type<tc>, window_params = [{pipeline_mode = #tpu.pipeline_mode<synchronous>, transform_indices = @transform_0, window_bounds = array<i64: 128, 128>}, {pipeline_mode = #tpu.pipeline_mode<synchronous>, transform_indices = @transform_1, window_bounds = array<i64: 128, 128>}, {pipeline_mode = #tpu.pipeline_mode<synchronous>, transform_indices = @transform_2, window_bounds = array<i64: 128, 128>}, {pipeline_mode = #tpu.pipeline_mode<synchronous>, transform_indices = @transform_3, window_bounds = array<i64: 1, 128>}, {pipeline_mode = #tpu.pipeline_mode<synchronous>, transform_indices = @transform_4, window_bounds = array<i64: 128, 128>}, {pipeline_mode = #tpu.pipeline_mode<synchronous>, transform_indices = @transform_5, window_bounds = array<i64: 1, 128>}, {pipeline_mode = #tpu.pipeline_mode<synchronous>, transform_indices = @transform_6, window_bounds = array<i64: 128, 128>}, {pipeline_mode = #tpu.pipeline_mode<synchronous>, transform_indices = @transform_7, window_bounds = array<i64: 1, 128>}, {pipeline_mode = #tpu.pipeline_mode<synchronous>, transform_indices = @transform_8, window_bounds = array<i64: 128, 128>}, {pipeline_mode = #tpu.pipeline_mode<synchronous>, transform_indices = @transform_9, window_bounds = array<i64: 1, 128>}, {pipeline_mode = #tpu.pipeline_mode<synchronous>, transform_indices = @transform_10, window_bounds = array<i64: 128, 128>}]} {
    %c0 = arith.constant 0 : index
    %c0_0 = arith.constant 0 : index
    %0 = vector.load %arg1[%c0, %c0_0] : memref<128x128xbf16, #tpu.memory_space<vmem>>, vector<128x128xbf16>
    %c0_1 = arith.constant 0 : index
    %c0_2 = arith.constant 0 : index
    %1 = vector.load %arg2[%c0_1, %c0_2] : memref<128x128xbf16, #tpu.memory_space<vmem>>, vector<128x128xbf16>
    %c0_3 = arith.constant 0 : index
    %c0_4 = arith.constant 0 : index
    %2 = vector.load %arg3[%c0_3, %c0_4] : memref<128x128xbf16, #tpu.memory_space<vmem>>, vector<128x128xbf16>
    %cst = arith.constant dense<0.000000e+00> : vector<128x128xf32>
    %3 = tpu.matmul %1, %2, %cst {dimension_numbers = #tpu.dot_dimension_numbers<[1], [0], [0], [1], [0, 0, 1, 1], [], []>} : vector<128x128xbf16>, vector<128x128xbf16>, vector<128x128xf32> -> vector<128x128xf32>
    %4 = arith.truncf %3 : vector<128x128xf32> to vector<128x128xbf16>
    %cst_5 = arith.constant dense<0.000000e+00> : vector<128x128xf32>
    %5 = tpu.matmul %0, %4, %cst_5 {dimension_numbers = #tpu.dot_dimension_numbers<[1], [0], [0], [1], [0, 0, 1, 1], [], []>} : vector<128x128xbf16>, vector<128x128xbf16>, vector<128x128xf32> -> vector<128x128xf32>
    %c0_6 = arith.constant 0 : index
    %c0_7 = arith.constant 0 : index
    %6 = vector.load %arg4[%c0_6, %c0_7] : memref<1x128xf32, #tpu.memory_space<vmem>>, vector<1x128xf32>
    %7 = vector.broadcast %6 : vector<1x128xf32> to vector<128x128xf32>
    %8 = arith.addf %5, %7 : vector<128x128xf32>
    %cst_8 = arith.constant 0.000000e+00 : f32
    %9 = vector.broadcast %cst_8 : f32 to vector<128x128xf32>
    %10 = arith.maximumf %8, %9 : vector<128x128xf32>
    %11 = arith.truncf %10 : vector<128x128xf32> to vector<128x128xbf16>
    %c0_9 = arith.constant 0 : index
    %c0_10 = arith.constant 0 : index
    %12 = vector.load %arg5[%c0_9, %c0_10] : memref<128x128xbf16, #tpu.memory_space<vmem>>, vector<128x128xbf16>
    %cst_11 = arith.constant dense<0.000000e+00> : vector<128x128xf32>
    %13 = tpu.matmul %11, %12, %cst_11 {dimension_numbers = #tpu.dot_dimension_numbers<[1], [0], [0], [1], [0, 0, 1, 1], [], []>} : vector<128x128xbf16>, vector<128x128xbf16>, vector<128x128xf32> -> vector<128x128xf32>
    %14 = arith.truncf %13 : vector<128x128xf32> to vector<128x128xbf16>
    %cst_12 = arith.constant dense<0.000000e+00> : vector<128x128xf32>
    %15 = tpu.matmul %0, %14, %cst_12 {dimension_numbers = #tpu.dot_dimension_numbers<[1], [0], [0], [1], [0, 0, 1, 1], [], []>} : vector<128x128xbf16>, vector<128x128xbf16>, vector<128x128xf32> -> vector<128x128xf32>
    %c0_13 = arith.constant 0 : index
    %c0_14 = arith.constant 0 : index
    %16 = vector.load %arg6[%c0_13, %c0_14] : memref<1x128xf32, #tpu.memory_space<vmem>>, vector<1x128xf32>
    %17 = vector.broadcast %16 : vector<1x128xf32> to vector<128x128xf32>
    %18 = arith.addf %15, %17 : vector<128x128xf32>
    %cst_15 = arith.constant 0.000000e+00 : f32
    %19 = vector.broadcast %cst_15 : f32 to vector<128x128xf32>
    %20 = arith.maximumf %18, %19 : vector<128x128xf32>
    %21 = arith.truncf %20 : vector<128x128xf32> to vector<128x128xbf16>
    %c0_16 = arith.constant 0 : index
    %c0_17 = arith.constant 0 : index
    %22 = vector.load %arg7[%c0_16, %c0_17] : memref<128x128xbf16, #tpu.memory_space<vmem>>, vector<128x128xbf16>
    %cst_18 = arith.constant dense<0.000000e+00> : vector<128x128xf32>
    %23 = tpu.matmul %21, %22, %cst_18 {dimension_numbers = #tpu.dot_dimension_numbers<[1], [0], [0], [1], [0, 0, 1, 1], [], []>} : vector<128x128xbf16>, vector<128x128xbf16>, vector<128x128xf32> -> vector<128x128xf32>
    %24 = arith.truncf %23 : vector<128x128xf32> to vector<128x128xbf16>
    %cst_19 = arith.constant dense<0.000000e+00> : vector<128x128xf32>
    %25 = tpu.matmul %0, %24, %cst_19 {dimension_numbers = #tpu.dot_dimension_numbers<[1], [0], [0], [1], [0, 0, 1, 1], [], []>} : vector<128x128xbf16>, vector<128x128xbf16>, vector<128x128xf32> -> vector<128x128xf32>
    %c0_20 = arith.constant 0 : index
    %c0_21 = arith.constant 0 : index
    %26 = vector.load %arg8[%c0_20, %c0_21] : memref<1x128xf32, #tpu.memory_space<vmem>>, vector<1x128xf32>
    %27 = vector.broadcast %26 : vector<1x128xf32> to vector<128x128xf32>
    %28 = arith.addf %25, %27 : vector<128x128xf32>
    %cst_22 = arith.constant 0.000000e+00 : f32
    %29 = vector.broadcast %cst_22 : f32 to vector<128x128xf32>
    %30 = arith.maximumf %28, %29 : vector<128x128xf32>
    %31 = arith.truncf %30 : vector<128x128xf32> to vector<128x128xbf16>
    %c0_23 = arith.constant 0 : index
    %c0_24 = arith.constant 0 : index
    %32 = vector.load %arg9[%c0_23, %c0_24] : memref<128x128xbf16, #tpu.memory_space<vmem>>, vector<128x128xbf16>
    %cst_25 = arith.constant dense<0.000000e+00> : vector<128x128xf32>
    %33 = tpu.matmul %31, %32, %cst_25 {dimension_numbers = #tpu.dot_dimension_numbers<[1], [0], [0], [1], [0, 0, 1, 1], [], []>} : vector<128x128xbf16>, vector<128x128xbf16>, vector<128x128xf32> -> vector<128x128xf32>
    %34 = arith.truncf %33 : vector<128x128xf32> to vector<128x128xbf16>
    %cst_26 = arith.constant dense<0.000000e+00> : vector<128x128xf32>
    %35 = tpu.matmul %0, %34, %cst_26 {dimension_numbers = #tpu.dot_dimension_numbers<[1], [0], [0], [1], [0, 0, 1, 1], [], []>} : vector<128x128xbf16>, vector<128x128xbf16>, vector<128x128xf32> -> vector<128x128xf32>
    %c0_27 = arith.constant 0 : index
    %c0_28 = arith.constant 0 : index
    %36 = vector.load %arg10[%c0_27, %c0_28] : memref<1x128xf32, #tpu.memory_space<vmem>>, vector<1x128xf32>
    %37 = vector.broadcast %36 : vector<1x128xf32> to vector<128x128xf32>
    %38 = arith.addf %35, %37 : vector<128x128xf32>
    %c0_29 = arith.constant 0 : index
    %c0_30 = arith.constant 0 : index
    %39 = vector.load %arg11[%c0_29, %c0_30] : memref<128x128xf32, #tpu.memory_space<vmem>>, vector<128x128xf32>
    tpu.vector_store %arg11[%c0_29, %c0_30], %38 {strides = array<i32>} : memref<128x128xf32, #tpu.memory_space<vmem>>, vector<128x128xf32>,
    return
  }
  func.func @transform_0(%arg0: i32) -> (i32, i32) {
    %c0_i32 = arith.constant 0 : i32
    %c0_i32_0 = arith.constant 0 : i32
    %c0_i32_1 = arith.constant 0 : i32
    return %c0_i32, %c0_i32_0 : i32, i32
  }
  func.func @transform_1(%arg0: i32) -> (i32, i32) {
    %c0_i32 = arith.constant 0 : i32
    %c0_i32_0 = arith.constant 0 : i32
    %c0_i32_1 = arith.constant 0 : i32
    return %c0_i32, %c0_i32_0 : i32, i32
  }
  func.func @transform_2(%arg0: i32) -> (i32, i32) {
    %c0_i32 = arith.constant 0 : i32
    %c0_i32_0 = arith.constant 0 : i32
    %c0_i32_1 = arith.constant 0 : i32
    return %c0_i32, %c0_i32_0 : i32, i32
  }
  func.func @transform_3(%arg0: i32) -> (i32, i32) {
    %c0_i32 = arith.constant 0 : i32
    %c0_i32_0 = arith.constant 0 : i32
    %c0_i32_1 = arith.constant 0 : i32
    return %c0_i32, %c0_i32_0 : i32, i32
  }
  func.func @transform_4(%arg0: i32) -> (i32, i32) {
    %c0_i32 = arith.constant 0 : i32
    %c0_i32_0 = arith.constant 0 : i32
    %c0_i32_1 = arith.constant 0 : i32
    return %c0_i32, %c0_i32_0 : i32, i32
  }
  func.func @transform_5(%arg0: i32) -> (i32, i32) {
    %c0_i32 = arith.constant 0 : i32
    %c0_i32_0 = arith.constant 0 : i32
    %c0_i32_1 = arith.constant 0 : i32
    return %c0_i32, %c0_i32_0 : i32, i32
  }
  func.func @transform_6(%arg0: i32) -> (i32, i32) {
    %c0_i32 = arith.constant 0 : i32
    %c0_i32_0 = arith.constant 0 : i32
    %c0_i32_1 = arith.constant 0 : i32
    return %c0_i32, %c0_i32_0 : i32, i32
  }
  func.func @transform_7(%arg0: i32) -> (i32, i32) {
    %c0_i32 = arith.constant 0 : i32
    %c0_i32_0 = arith.constant 0 : i32
    %c0_i32_1 = arith.constant 0 : i32
    return %c0_i32, %c0_i32_0 : i32, i32
  }
  func.func @transform_8(%arg0: i32) -> (i32, i32) {
    %c0_i32 = arith.constant 0 : i32
    %c0_i32_0 = arith.constant 0 : i32
    %c0_i32_1 = arith.constant 0 : i32
    return %c0_i32, %c0_i32_0 : i32, i32
  }
  func.func @transform_9(%arg0: i32) -> (i32, i32) {
    %c0_i32 = arith.constant 0 : i32
    %c0_i32_0 = arith.constant 0 : i32
    %c0_i32_1 = arith.constant 0 : i32
    return %c0_i32, %c0_i32_0 : i32, i32
  }
  func.func @transform_10(%arg0: i32) -> (i32, i32) {
    %c0_i32 = arith.constant 0 : i32
    %c0_i32_0 = arith.constant 0 : i32
    %c0_i32_1 = arith.constant 0 : i32
    return %c0_i32, %c0_i32_0 : i32, i32
  }
}

</mosaic_0001>

<bundles_post_ra>
// kernel: tpu_custom_call.1
= control target key start
LH: loop header
LB: loop body
LE: loop exit
PB: predicated region body
PF: predicated region fallthrough
CT: control target
= control target key end

     0   :  { %15 = vsyncpa [#allocation3], 0  ;;  %s2355_s0 = inlined_call_operand.hbm [shape: bf16[128,128], index: 0, kind: input, shape index: {}]   ;;  %s2356_s1 = inlined_call_operand.hbm [shape: bf16[128,128], index: 1, kind: input, shape index: {}]   ;;  %s2357_s2 = inlined_call_operand.hbm [shape: bf16[128,128], index: 2, kind: input, shape index: {}]   ;;  %s2358_s3 = inlined_call_operand.vmem [shape: f32[1,128], index: 3, kind: input, shape index: {}]   ;;  %s2359_s4 = inlined_call_operand.hbm [shape: bf16[128,128], index: 4, kind: input, shape index: {}]   ;;  %s2360_s5 = inlined_call_operand.vmem [shape: f32[1,128], index: 5, kind: input, shape index: {}]   ;;  %s2361_s6 = inlined_call_operand.hbm [shape: bf16[128,128], index: 6, kind: input, shape index: {}]   ;;  %s2362_s7 = inlined_call_operand.vmem [shape: f32[1,128], index: 7, kind: input, shape index: {}]   ;;  %s2363_s8 = inlined_call_operand.hbm [shape: bf16[128,128], index: 8, kind: input, shape index: {}]   ;;  %s2364_s9 = inlined_call_operand.vmem [shape: f32[1,128], index: 9, kind: input, shape index: {}]   ;;  %s2365_s10 = inlined_call_operand.hbm [shape: f32[128,128], index: 10, kind: output, shape index: {}]  }
   0x1   :  { %16 = vsyncpa [#allocation6], 0 }
   0x2   :  { %17 = vsyncpa [#allocation9], 0 }
   0x3   :  { %18 = vsyncpa [#allocation12], 0 }
   0x4   :  { %19 = vsyncpa [#allocation4], 0  ;;  %s2106_s13 = smov [#allocation5]   ;;  %s2107_s15 = smov [#allocation8]  }
   0x5   :  { %s37_s14 = sshll.u32 %s2106_s13, 4  ;;  %s63_s16 = sshll.u32 %s2107_s15, 4  ;;  %s38_s14 = int_to_ptr.vmem [resolvable:$true] %s37_s14  ;;  %s2172_s16 = int_to_ptr.vmem [resolvable:$true] %s63_s16 }
   0x6   :  { %s1942_s19 = scalar_lea.hbm %s2356_s1, 1024 }
   0x7   :  { %p1943_p0 = scmp.ne.s32.totalorder %s2356_s1, %s1942_s19  ;;  %p1946_p1 = scmp.lt.u32.totalorder %s1942_s19, %s2356_s1 }
   0x9   :  { %p1948_p2 = pnand %p1946_p1, %p1943_p0 }
   0xb   :  { %1951 = shalt.err (!%p1948_p2)
}
   0xc   :  { %s1952_s24 = scalar_lea.vmem %s38_s14, 1024  ;;  %p1957_p4 = scmp.lt.s32.totalorder %s38_s14, %s38_s14 }
   0xd   :  { %p1953_p3 = scmp.ne.s32.totalorder %s38_s14, %s1952_s24  ;;  %p1958_p5 = scmp.lt.s32.totalorder %s1952_s24, %s1952_s24 }
   0xf   :  { %p1959_p6 = por %p1958_p5, %p1957_p4 }
  0x11   :  { %p1960_p7 = pnand %p1959_p6, %p1953_p3 }
  0x13   :  { %1963 = shalt.err (!%p1960_p7)
}
  0x14   :  { %s2108_s25 = smov 64   ;;  %s2109_s26 = smov 4  }
  0x15   :  { %43 = dma.hbm_to_vmem [thread:$0]  %s2356_s1, 1024, %s38_s14, [#allocation6], %s2108_s25, %s2108_s25, %s2109_s26  }
  0x16   :  { %s1964_s11 = scalar_lea.hbm %s2359_s4, 1024 }
  0x17   :  { %p1965_p8 = scmp.ne.s32.totalorder %s2359_s4, %s1964_s11  ;;  %p1968_p9 = scmp.lt.u32.totalorder %s1964_s11, %s2359_s4 }
  0x19   :  { %p1970_p10 = pnand %p1968_p9, %p1965_p8 }
  0x1b   :  { %1973 = shalt.err (!%p1970_p10)
}
  0x1c   :  { %s1974_s18 = scalar_lea.vmem %s2172_s16, 1024  ;;  %p1979_p12 = scmp.lt.s32.totalorder %s2172_s16, %s2172_s16 }
  0x1d   :  { %p1975_p11 = scmp.ne.s32.totalorder %s2172_s16, %s1974_s18  ;;  %p1980_p13 = scmp.lt.s32.totalorder %s1974_s18, %s1974_s18 }
  0x1f   :  { %p1981_p0 = por %p1980_p13, %p1979_p12 }
  0x21   :  { %p1982_p1 = pnand %p1981_p0, %p1975_p11 }
  0x23   :  { %1985 = shalt.err (!%p1982_p1)
}
  0x24   :  { %69 = dma.hbm_to_vmem [thread:$0]  %s2359_s4, 1024, %s2172_s16, [#allocation9], %s2108_s25, %s2108_s25, %s2109_s26  }
  0x25   :  { %s2110_s19 = smov [#allocation2]   ;;  %s2111_s21 = smov [#allocation7]  }
  0x26   :  { %s25_s20 = sshll.u32 %s2110_s19, 4  ;;  %s49_s22 = sshll.u32 %s2111_s21, 4  ;;  %s26_s20 = int_to_ptr.vmem [resolvable:$true] %s25_s20  ;;  %s2209_s22 = int_to_ptr.vmem [resolvable:$true] %s49_s22 }
  0x27   :  { %s1986_s27 = scalar_lea.hbm %s2355_s0, 1024 }
  0x28   :  { %p1987_p2 = scmp.ne.s32.totalorder %s2355_s0, %s1986_s27  ;;  %p1990_p3 = scmp.lt.u32.totalorder %s1986_s27, %s2355_s0 }
  0x2a   :  { %p1992_p4 = pnand %p1990_p3, %p1987_p2 }
  0x2c   :  { %1995 = shalt.err (!%p1992_p4)
}
  0x2d   :  { %s1996_s4 = scalar_lea.vmem %s26_s20, 1024  ;;  %p2001_p6 = scmp.lt.s32.totalorder %s26_s20, %s26_s20 }
  0x2e   :  { %p1997_p5 = scmp.ne.s32.totalorder %s26_s20, %s1996_s4  ;;  %p2002_p7 = scmp.lt.s32.totalorder %s1996_s4, %s1996_s4 }
  0x30   :  { %p2003_p8 = por %p2002_p7, %p2001_p6 }
  0x32   :  { %p2004_p9 = pnand %p2003_p8, %p1997_p5 }
  0x34   :  { %2007 = shalt.err (!%p2004_p9)
}
  0x35   :  { %31 = dma.hbm_to_vmem [thread:$0]  %s2355_s0, 1024, %s26_s20, [#allocation3], %s2108_s25, %s2108_s25, %s2109_s26  }
  0x36   :  { %s2008_s17 = scalar_lea.hbm %s2357_s2, 1024 }
  0x37   :  { %p2009_p10 = scmp.ne.s32.totalorder %s2357_s2, %s2008_s17  ;;  %p2012_p11 = scmp.lt.u32.totalorder %s2008_s17, %s2357_s2 }
  0x39   :  { %p2014_p12 = pnand %p2012_p11, %p2009_p10 }
  0x3b   :  { %2017 = shalt.err (!%p2014_p12)
}
  0x3c   :  { %s2018_s21 = scalar_lea.vmem %s2209_s22, 1024  ;;  %p2023_p0 = scmp.lt.s32.totalorder %s2209_s22, %s2209_s22 }
  0x3d   :  { %p2019_p13 = scmp.ne.s32.totalorder %s2209_s22, %s2018_s21  ;;  %p2024_p1 = scmp.lt.s32.totalorder %s2018_s21, %s2018_s21 }
  0x3f   :  { %p2025_p2 = por %p2024_p1, %p2023_p0 }
  0x41   :  { %p2026_p3 = pnand %p2025_p2, %p2019_p13 }
  0x43   :  { %2029 = shalt.err (!%p2026_p3)
}
  0x44   :  { %55 = dma.hbm_to_vmem [thread:$0]  %s2357_s2, 1024, %s2209_s22, [#allocation6], %s2108_s25, %s2108_s25, %s2109_s26  }
  0x45   :  { %s2112_s23 = smov [#allocation10]   ;;  %s2113_s27 = smov [#allocation11]  }
  0x46   :  { %s77_s24 = sshll.u32 %s2112_s23, 4  ;;  %s91_s28 = sshll.u32 %s2113_s27, 4  ;;  %s78_s24 = int_to_ptr.vmem [resolvable:$true] %s77_s24  ;;  %s2246_s28 = int_to_ptr.vmem [resolvable:$true] %s91_s28 }
  0x47   :  { %s2030_s11 = scalar_lea.hbm %s2361_s6, 1024 }
  0x48   :  { %p2031_p4 = scmp.ne.s32.totalorder %s2361_s6, %s2030_s11  ;;  %p2034_p5 = scmp.lt.u32.totalorder %s2030_s11, %s2361_s6 }
  0x4a   :  { %p2036_p6 = pnand %p2034_p5, %p2031_p4 }
  0x4c   :  { %2039 = shalt.err (!%p2036_p6)
}
  0x4d   :  { %s2040_s2 = scalar_lea.vmem %s78_s24, 1024  ;;  %p2045_p8 = scmp.lt.s32.totalorder %s78_s24, %s78_s24 }
  0x4e   :  { %p2041_p7 = scmp.ne.s32.totalorder %s78_s24, %s2040_s2  ;;  %p2046_p9 = scmp.lt.s32.totalorder %s2040_s2, %s2040_s2 }
  0x50   :  { %p2047_p10 = por %p2046_p9, %p2045_p8 }
  0x52   :  { %p2048_p11 = pnand %p2047_p10, %p2041_p7 }
  0x54   :  { %2051 = shalt.err (!%p2048_p11)
}
  0x55   :  { %83 = dma.hbm_to_vmem [thread:$0]  %s2361_s6, 1024, %s78_s24, [#allocation9], %s2108_s25, %s2108_s25, %s2109_s26  }
  0x56   :  { %s2052_s1 = scalar_lea.hbm %s2363_s8, 1024 }
  0x57   :  { %p2053_p12 = scmp.ne.s32.totalorder %s2363_s8, %s2052_s1  ;;  %p2056_p13 = scmp.lt.u32.totalorder %s2052_s1, %s2363_s8 }
  0x59   :  { %p2058_p0 = pnand %p2056_p13, %p2053_p12 }
  0x5b   :  { %2061 = shalt.err (!%p2058_p0)
}
  0x5c   :  { %s2062_s20 = scalar_lea.vmem %s2246_s28, 1024  ;;  %p2067_p2 = scmp.lt.s32.totalorder %s2246_s28, %s2246_s28 }
  0x5d   :  { %p2063_p1 = scmp.ne.s32.totalorder %s2246_s28, %s2062_s20  ;;  %p2068_p3 = scmp.lt.s32.totalorder %s2062_s20, %s2062_s20 }
  0x5f   :  { %p2069_p4 = por %p2068_p3, %p2067_p2 }
  0x61   :  { %p2070_p5 = pnand %p2069_p4, %p2063_p1 }
  0x63   :  { %2073 = shalt.err (!%p2070_p5)
}
  0x64   :  { %97 = dma.hbm_to_vmem [thread:$0]  %s2363_s8, 1024, %s2246_s28, [#allocation12], %s2108_s25, %s2108_s25, %s2109_s26  }
  0x65   :  { %2096 = dma.done.wait [#allocation3], 1024  }
  0x66   :  { %2097 = vsyncadd [#allocation3], 4294966272 }
  0x67   :  { %2098 = dma.done.wait [#allocation6], 2048  }
  0x68   :  { %2099 = vsyncadd [#allocation6], 4294965248 }
  0x69   :  { %2100 = dma.done.wait [#allocation9], 2048  }
  0x6a   :  { %2101 = vsyncadd [#allocation9], 4294965248 }
  0x6b   :  { %2102 = dma.done.wait [#allocation12], 1024  }
  0x6c   :  { %2103 = vsyncadd [#allocation12], 4294966272  ;;  %v1894_v0 = vld [vmem:[#allocation7] sm:$0xff]   ;;  %v1895_v1 = vld [vmem:[#allocation7 + $0x8] sm:$0xff]  }
  0x6d   :  { %1627 = vmatprep.subr.bf16.mxu0 %v1894_v0  ;;  %v1896_v2 = vld [vmem:[#allocation7 + $0x10] sm:$0xff]   ;;  %v1897_v3 = vld [vmem:[#allocation7 + $0x18] sm:$0xff]   ;;  %v1902_v4 = vld [vmem:[#allocation5] sm:$0xff]  }
  0x6e   :  { %1628 = vmatpush3.bf16.msra.mxu0 %v1894_v0  ;;  %1643 = vmatprep.mubr.bf16.mxu0 %v1902_v4  ;;  %v1898_v5 = vld [vmem:[#allocation7 + $0x20] sm:$0xff]   ;;  %v1899_v6 = vld [vmem:[#allocation7 + $0x28] sm:$0xff]   ;;  %v1900_v7 = vld [vmem:[#allocation7 + $0x30] sm:$0xff]  }
  0x6f   :  { %1629 = vmatprep.subr.bf16.mxu0 %v1895_v1  ;;  %v1901_v8 = vld [vmem:[#allocation7 + $0x38] sm:$0xff]   ;;  %v1903_v9 = vld [vmem:[#allocation5 + $0x8] sm:$0xff]   ;;  %v1904_v10 = vld [vmem:[#allocation5 + $0x10] sm:$0xff]  }
  0x70   :  { %v1905_v11 = vld [vmem:[#allocation5 + $0x18] sm:$0xff]   ;;  %v1906_v12 = vld [vmem:[#allocation5 + $0x20] sm:$0xff]   ;;  %v1907_v13 = vld [vmem:[#allocation5 + $0x28] sm:$0xff]  }
  0x71   :  { %v1908_v14 = vld [vmem:[#allocation5 + $0x30] sm:$0xff]   ;;  %v1909_v15 = vld [vmem:[#allocation5 + $0x38] sm:$0xff]   ;;  %v2283_v16 = vld [vmem:[#allocation2] sm:$0xff]  }
  0x72   :  { %1630 = vmatpush3.bf16.msra.mxu0 %v1895_v1  ;;  %1675 = vmatprep.mubr.bf16.mxu1 %v2283_v16  ;;  %v1918_v17 = vld [vmem:[#allocation8] sm:$0xff]   ;;  %v1919_v18 = vld [vmem:[#allocation8 + $0x8] sm:$0xff]   ;;  %v1920_v19 = vld [vmem:[#allocation8 + $0x10] sm:$0xff]  }
  0x73   :  { %1631 = vmatprep.subr.bf16.mxu0 %v1896_v2  ;;  %v1921_v20 = vld [vmem:[#allocation8 + $0x18] sm:$0xff]   ;;  %v1922_v21 = vld [vmem:[#allocation8 + $0x20] sm:$0xff]   ;;  %v1923_v22 = vld [vmem:[#allocation8 + $0x28] sm:$0xff]  }
  0x74   :  { %v2286_v47 = vld [vmem:[#allocation2 + $0x8] sm:$0xff]   ;;  %v2288_v48 = vld [vmem:[#allocation2 + $0x10] sm:$0xff]   ;;  %v2292_v49 = vld [vmem:[#allocation2 + $0x18] sm:$0xff]  }
  0x75   :  { %v2294_v50 = vld [vmem:[#allocation2 + $0x20] sm:$0xff]   ;;  %v2298_v51 = vld [vmem:[#allocation2 + $0x28] sm:$0xff]   ;;  %v2300_v52 = vld [vmem:[#allocation2 + $0x30] sm:$0xff]  }
  0x76   :  { %1632 = vmatpush3.bf16.msra.mxu0 %v1896_v2  ;;  %v2304_v53 = vld [vmem:[#allocation2 + $0x38] sm:$0xff]   ;;  %v1924_v54 = vld [vmem:[#allocation8 + $0x30] sm:$0xff]   ;;  %v1463_v56 = vld [vmem:[%s2358_s3] ss:$0 sm:$0xff] }
  0x77   :  { %1633 = vmatprep.subr.bf16.mxu0 %v1897_v3  ;;  %v1925_v55 = vld [vmem:[#allocation8 + $0x38] sm:$0xff]  }
  0x7a   :  { %1634 = vmatpush3.bf16.msra.mxu0 %v1897_v3 }
  0x7b   :  { %1635 = vmatprep.subr.bf16.mxu0 %v1898_v5 }
  0x7e   :  { %1636 = vmatpush3.bf16.msra.mxu0 %v1898_v5 }
  0x7f   :  { %1637 = vmatprep.subr.bf16.mxu0 %v1899_v6 }
  0x82   :  { %1638 = vmatpush3.bf16.msra.mxu0 %v1899_v6 }
  0x83   :  { %1639 = vmatprep.subr.bf16.mxu0 %v1900_v7 }
  0x86   :  { %1640 = vmatpush3.bf16.msra.mxu0 %v1900_v7 }
  0x87   :  { %1641 = vmatprep.subr.bf16.mxu0 %v1901_v8 }
  0x8a   :  { %1642 = vmatpush3.bf16.msra.mxu0 %v1901_v8 }
  0x8b   :  { %1691 = vmatprep.subr.bf16.mxu0 %v1918_v17 }
  0x8d   :  { %1644 = vmatmul.mubr.bf16.vlgmr.msra.gmra.mrb[0].mxu0 %v1903_v9 }
  0x8e   :  { %1647 = vmatprep.mubr.bf16.mxu0 %v1904_v10  ;;  %1692 = vmatpush3.bf16.msra.mxu0 %v1918_v17 }
  0x8f   :  { %1693 = vmatprep.subr.bf16.mxu0 %v1919_v18 }
  0x92   :  { %1694 = vmatpush3.bf16.msra.mxu0 %v1919_v18 }
  0x93   :  { %1695 = vmatprep.subr.bf16.mxu0 %v1920_v19 }
  0x95   :  { %1648 = vmatmul.mubr.bf16.gmra.mrb[4].mxu0 %v1905_v11 }
  0x96   :  { %1651 = vmatprep.mubr.bf16.mxu0 %v1906_v12  ;;  %1696 = vmatpush3.bf16.msra.mxu0 %v1920_v19 }
  0x97   :  { %1697 = vmatprep.subr.bf16.mxu0 %v1921_v20 }
  0x9a   :  { %1698 = vmatpush3.bf16.msra.mxu0 %v1921_v20 }
  0x9b   :  { %1699 = vmatprep.subr.bf16.mxu0 %v1922_v21 }
  0x9d   :  { %1652 = vmatmul.mubr.bf16.gmra.mrb[8].mxu0 %v1907_v13 }
  0x9e   :  { %1655 = vmatprep.mubr.bf16.mxu0 %v1908_v14  ;;  %1700 = vmatpush3.bf16.msra.mxu0 %v1922_v21 }
  0x9f   :  { %1701 = vmatprep.subr.bf16.mxu0 %v1923_v22 }
  0xa2   :  { %1702 = vmatpush3.bf16.msra.mxu0 %v1923_v22 }
  0xa3   :  { %1703 = vmatprep.subr.bf16.mxu0 %v1924_v54 }
  0xa5   :  { %1656 = vmatmul.mubr.bf16.gmra.mrb[12].mxu0 %v1909_v15 }
  0xa6   :  { %1704 = vmatpush3.bf16.msra.mxu0 %v1924_v54 }
  0xa7   :  { %1705 = vmatprep.subr.bf16.mxu0 %v1925_v55 }
  0xaa   :  { %1706 = vmatpush3.bf16.msra.mxu0 %v1925_v55 }
 0x160   :  { %v1645_v23 = vpop.f32.mrb[0].mxu0 }
 0x161   :  { %v297_v24 = vpop.f32.mrb[1].mxu0 }
 0x162   :  { %v1646_v25 = vpop.f32.mrb[2].mxu0 }
 0x163   :  { %v361_v26 = vpack.c.bf16 %v1646_v25, %v1645_v23  ;;  %v300_v27 = vpop.f32.mrb[3].mxu0 }
 0x164   :  { %v360_v28 = vpack.c.bf16 %v300_v27, %v297_v24 }
 0x166   :  { %1659 = vmatprep.subr.bf16.mxu1 %v360_v28 }
 0x167   :  { %1660 = vmatpush3.bf16.msra.mxu1 %v360_v28 }
 0x168   :  { %v1649_v29 = vpop.f32.mrb[4].mxu0  ;;  %1661 = vmatprep.subr.bf16.mxu1 %v361_v26 }
 0x169   :  { %v313_v30 = vpop.f32.mrb[5].mxu0 }
 0x16a   :  { %v1650_v31 = vpop.f32.mrb[6].mxu0 }
 0x16b   :  { %v363_v32 = vpack.c.bf16 %v1650_v31, %v1649_v29  ;;  %v316_v33 = vpop.f32.mrb[7].mxu0  ;;  %1662 = vmatpush3.bf16.msra.mxu1 %v361_v26 }
 0x16c   :  { %v362_v34 = vpack.c.bf16 %v316_v33, %v313_v30 }
 0x16e   :  { %1663 = vmatprep.subr.bf16.mxu1 %v362_v34 }
 0x16f   :  { %1664 = vmatpush3.bf16.msra.mxu1 %v362_v34 }
 0x170   :  { %v1653_v35 = vpop.f32.mrb[8].mxu0  ;;  %1665 = vmatprep.subr.bf16.mxu1 %v363_v32 }
 0x171   :  { %v329_v36 = vpop.f32.mrb[9].mxu0 }
 0x172   :  { %v1654_v37 = vpop.f32.mrb[10].mxu0 }
 0x173   :  { %v365_v38 = vpack.c.bf16 %v1654_v37, %v1653_v35  ;;  %v332_v39 = vpop.f32.mrb[11].mxu0  ;;  %1666 = vmatpush3.bf16.msra.mxu1 %v363_v32 }
 0x174   :  { %v364_v40 = vpack.c.bf16 %v332_v39, %v329_v36 }
 0x176   :  { %1667 = vmatprep.subr.bf16.mxu1 %v364_v40 }
 0x177   :  { %1668 = vmatpush3.bf16.msra.mxu1 %v364_v40 }
 0x178   :  { %v1657_v41 = vpop.f32.mrb[12].mxu0  ;;  %1669 = vmatprep.subr.bf16.mxu1 %v365_v38 }
 0x179   :  { %v345_v42 = vpop.f32.mrb[13].mxu0 }
 0x17a   :  { %v1658_v43 = vpop.f32.mrb[14].mxu0 }
 0x17b   :  { %v367_v44 = vpack.c.bf16 %v1658_v43, %v1657_v41  ;;  %v348_v45 = vpop.f32.mrb[15].mxu0  ;;  %1670 = vmatpush3.bf16.msra.mxu1 %v365_v38 }
 0x17c   :  { %v366_v46 = vpack.c.bf16 %v348_v45, %v345_v42 }
 0x17e   :  { %1671 = vmatprep.subr.bf16.mxu1 %v366_v46 }
 0x17f   :  { %1672 = vmatpush3.bf16.msra.mxu1 %v366_v46 }
 0x180   :  { %1673 = vmatprep.subr.bf16.mxu1 %v367_v44 }
 0x183   :  { %1674 = vmatpush3.bf16.msra.mxu1 %v367_v44 }
 0x186   :  { %1676 = vmatmul.mubr.bf16.vlgmr.msra.gmra.mrb[0].mxu1 %v2286_v47 }
 0x187   :  { %1679 = vmatprep.mubr.bf16.mxu1 %v2288_v48 }
 0x18e   :  { %1680 = vmatmul.mubr.bf16.gmra.mrb[4].mxu1 %v2292_v49 }
 0x18f   :  { %1683 = vmatprep.mubr.bf16.mxu1 %v2294_v50 }
 0x196   :  { %1684 = vmatmul.mubr.bf16.gmra.mrb[8].mxu1 %v2298_v51 }
 0x197   :  { %1687 = vmatprep.mubr.bf16.mxu1 %v2300_v52 }
 0x19e   :  { %1688 = vmatmul.mubr.bf16.gmra.mrb[12].mxu1 %v2304_v53 }
 0x19f   :  { %1739 = vmatprep.mubr.bf16.mxu1 %v2283_v16 }
 0x259   :  { %v1677_v57 = vpop.f32.mrb[0].mxu1 }
 0x25a   :  { %v466_v58 = vadd.f32 %v1677_v57, %v1463_v56  ;;  %v457_v59 = vpop.f32.mrb[1].mxu1 }
 0x25b   :  { %v458_v60 = vadd.f32 %v1463_v56, %v457_v59  ;;  %v1678_v61 = vpop.f32.mrb[2].mxu1  ;;  %v1927_v59 = vld [vmem:[#allocation10 + $0x8] sm:$0xff]  }
 0x25c   :  { %v469_v62 = vadd.f32 %v1678_v61, %v1463_v56  ;;  %v460_v63 = vpop.f32.mrb[3].mxu1  ;;  %v522_v1 = vmax.f32 %v466_v58, 0.0  ;;  %v1926_v58 = vld [vmem:[#allocation10] sm:$0xff]   ;;  %v1929_v61 = vld [vmem:[#allocation10 + $0x18] sm:$0xff]  }
 0x25d   :  { %v461_v0 = vadd.f32 %v1463_v56, %v460_v63  ;;  %v520_v3 = vmax.f32 %v458_v60, 0.0  ;;  %1755 = vmatprep.subr.bf16.mxu0 %v1926_v58  ;;  %v1928_v60 = vld [vmem:[#allocation10 + $0x10] sm:$0xff]  }
 0x25e   :  { %v523_v2 = vmax.f32 %v469_v62, 0.0  ;;  %v1931_v62 = vld [vmem:[#allocation10 + $0x28] sm:$0xff]  }
 0x25f   :  { %v521_v4 = vmax.f32 %v461_v0, 0.0 }
 0x260   :  { %v537_v5 = vpack.c.bf16 %v523_v2, %v522_v1 }
 0x261   :  { %v536_v6 = vpack.c.bf16 %v521_v4, %v520_v3  ;;  %v1681_v7 = vpop.f32.mrb[4].mxu1 }
 0x262   :  { %v482_v8 = vadd.f32 %v1681_v7, %v1463_v56  ;;  %v473_v9 = vpop.f32.mrb[5].mxu1 }
 0x263   :  { %v474_v10 = vadd.f32 %v1463_v56, %v473_v9  ;;  %v1682_v11 = vpop.f32.mrb[6].mxu1  ;;  %1707 = vmatprep.mubr.bf16.mxu0 %v536_v6 }
 0x264   :  { %v485_v12 = vadd.f32 %v1682_v11, %v1463_v56  ;;  %v476_v13 = vpop.f32.mrb[7].mxu1  ;;  %1708 = vmatmul.mubr.bf16.vlgmr.msra.gmra.mrb[16].mxu0 %v537_v5  ;;  %v526_v15 = vmax.f32 %v482_v8, 0.0 }
 0x265   :  { %v477_v14 = vadd.f32 %v1463_v56, %v476_v13  ;;  %v524_v18 = vmax.f32 %v474_v10, 0.0  ;;  %1756 = vmatpush3.bf16.msra.mxu0 %v1926_v58 }
 0x266   :  { %v527_v17 = vmax.f32 %v485_v12, 0.0  ;;  %1757 = vmatprep.subr.bf16.mxu0 %v1927_v59 }
 0x267   :  { %v525_v19 = vmax.f32 %v477_v14, 0.0 }
 0x268   :  { %v539_v20 = vpack.c.bf16 %v527_v17, %v526_v15 }
 0x269   :  { %v538_v21 = vpack.c.bf16 %v525_v19, %v524_v18  ;;  %v1685_v22 = vpop.f32.mrb[8].mxu1  ;;  %1758 = vmatpush3.bf16.msra.mxu0 %v1927_v59 }
 0x26a   :  { %v498_v23 = vadd.f32 %v1685_v22, %v1463_v56  ;;  %v489_v24 = vpop.f32.mrb[9].mxu1  ;;  %1759 = vmatprep.subr.bf16.mxu0 %v1928_v60 }
 0x26b   :  { %v490_v25 = vadd.f32 %v1463_v56, %v489_v24  ;;  %v1686_v26 = vpop.f32.mrb[10].mxu1  ;;  %1711 = vmatprep.mubr.bf16.mxu0 %v538_v21  ;;  %v1932_v24 = vld [vmem:[#allocation10 + $0x30] sm:$0xff]  }
 0x26c   :  { %v501_v27 = vadd.f32 %v1686_v26, %v1463_v56  ;;  %v492_v28 = vpop.f32.mrb[11].mxu1  ;;  %1712 = vmatmul.mubr.bf16.gmra.mrb[20].mxu0 %v539_v20  ;;  %v530_v30 = vmax.f32 %v498_v23, 0.0  ;;  %v1480_v26 = vld [vmem:[%s2360_s5] ss:$0 sm:$0xff] }
 0x26d   :  { %v493_v29 = vadd.f32 %v1463_v56, %v492_v28  ;;  %v528_v32 = vmax.f32 %v490_v25, 0.0  ;;  %1760 = vmatpush3.bf16.msra.mxu0 %v1928_v60  ;;  %v1933_v25 = vld [vmem:[#allocation10 + $0x38] sm:$0xff]  }
 0x26e   :  { %v531_v31 = vmax.f32 %v501_v27, 0.0  ;;  %1761 = vmatprep.subr.bf16.mxu0 %v1929_v61 }
 0x26f   :  { %v529_v33 = vmax.f32 %v493_v29, 0.0 }
 0x270   :  { %v541_v34 = vpack.c.bf16 %v531_v31, %v530_v30 }
 0x271   :  { %v540_v35 = vpack.c.bf16 %v529_v33, %v528_v32  ;;  %v1689_v36 = vpop.f32.mrb[12].mxu1  ;;  %1762 = vmatpush3.bf16.msra.mxu0 %v1929_v61 }
 0x272   :  { %v514_v37 = vadd.f32 %v1689_v36, %v1463_v56  ;;  %v505_v38 = vpop.f32.mrb[13].mxu1 }
 0x273   :  { %v506_v39 = vadd.f32 %v1463_v56, %v505_v38  ;;  %v1690_v40 = vpop.f32.mrb[14].mxu1  ;;  %1715 = vmatprep.mubr.bf16.mxu0 %v540_v35 }
 0x274   :  { %v517_v41 = vadd.f32 %v1690_v40, %v1463_v56  ;;  %v508_v42 = vpop.f32.mrb[15].mxu1  ;;  %1716 = vmatmul.mubr.bf16.gmra.mrb[24].mxu0 %v541_v34  ;;  %v534_v44 = vmax.f32 %v514_v37, 0.0 }
 0x275   :  { %v509_v43 = vadd.f32 %v1463_v56, %v508_v42  ;;  %v532_v46 = vmax.f32 %v506_v39, 0.0  ;;  %v1930_v56 = vld [vmem:[#allocation10 + $0x20] sm:$0xff]  }
 0x276   :  { %v535_v45 = vmax.f32 %v517_v41, 0.0  ;;  %1763 = vmatprep.subr.bf16.mxu0 %v1930_v56 }
 0x277   :  { %v533_v54 = vmax.f32 %v509_v43, 0.0  ;;  %1764 = vmatpush3.bf16.msra.mxu0 %v1930_v56 }
 0x278   :  { %v543_v55 = vpack.c.bf16 %v535_v45, %v534_v44  ;;  %1765 = vmatprep.subr.bf16.mxu0 %v1931_v62 }
 0x279   :  { %v542_v57 = vpack.c.bf16 %v533_v54, %v532_v46 }
 0x27b   :  { %1719 = vmatprep.mubr.bf16.mxu0 %v542_v57  ;;  %1766 = vmatpush3.bf16.msra.mxu0 %v1931_v62 }
 0x27c   :  { %1720 = vmatmul.mubr.bf16.gmra.mrb[28].mxu0 %v543_v55  ;;  %1767 = vmatprep.subr.bf16.mxu0 %v1932_v24 }
 0x27f   :  { %1768 = vmatpush3.bf16.msra.mxu0 %v1932_v24 }
 0x280   :  { %1769 = vmatprep.subr.bf16.mxu0 %v1933_v25 }
 0x283   :  { %1770 = vmatpush3.bf16.msra.mxu0 %v1933_v25 }
 0x337   :  { %v1709_v63 = vpop.f32.mrb[16].mxu0 }
 0x338   :  { %v642_v0 = vpop.f32.mrb[17].mxu0 }
 0x339   :  { %v1710_v1 = vpop.f32.mrb[18].mxu0 }
 0x33a   :  { %v706_v2 = vpack.c.bf16 %v1710_v1, %v1709_v63  ;;  %v645_v3 = vpop.f32.mrb[19].mxu0 }
 0x33b   :  { %v705_v4 = vpack.c.bf16 %v645_v3, %v642_v0 }
 0x33d   :  { %1723 = vmatprep.subr.bf16.mxu1 %v705_v4 }
 0x33e   :  { %1724 = vmatpush3.bf16.msra.mxu1 %v705_v4 }
 0x33f   :  { %v1713_v5 = vpop.f32.mrb[20].mxu0  ;;  %1725 = vmatprep.subr.bf16.mxu1 %v706_v2 }
 0x340   :  { %v658_v6 = vpop.f32.mrb[21].mxu0 }
 0x341   :  { %v1714_v7 = vpop.f32.mrb[22].mxu0 }
 0x342   :  { %v708_v8 = vpack.c.bf16 %v1714_v7, %v1713_v5  ;;  %v661_v9 = vpop.f32.mrb[23].mxu0  ;;  %1726 = vmatpush3.bf16.msra.mxu1 %v706_v2 }
 0x343   :  { %v707_v10 = vpack.c.bf16 %v661_v9, %v658_v6 }
 0x345   :  { %1727 = vmatprep.subr.bf16.mxu1 %v707_v10 }
 0x346   :  { %1728 = vmatpush3.bf16.msra.mxu1 %v707_v10 }
 0x347   :  { %v1717_v11 = vpop.f32.mrb[24].mxu0  ;;  %1729 = vmatprep.subr.bf16.mxu1 %v708_v8 }
 0x348   :  { %v674_v12 = vpop.f32.mrb[25].mxu0 }
 0x349   :  { %v1718_v13 = vpop.f32.mrb[26].mxu0 }
 0x34a   :  { %v710_v14 = vpack.c.bf16 %v1718_v13, %v1717_v11  ;;  %v677_v15 = vpop.f32.mrb[27].mxu0  ;;  %1730 = vmatpush3.bf16.msra.mxu1 %v708_v8 }
 0x34b   :  { %v709_v17 = vpack.c.bf16 %v677_v15, %v674_v12 }
 0x34d   :  { %1731 = vmatprep.subr.bf16.mxu1 %v709_v17 }
 0x34e   :  { %1732 = vmatpush3.bf16.msra.mxu1 %v709_v17 }
 0x34f   :  { %v1721_v18 = vpop.f32.mrb[28].mxu0  ;;  %1733 = vmatprep.subr.bf16.mxu1 %v710_v14 }
 0x350   :  { %v690_v19 = vpop.f32.mrb[29].mxu0 }
 0x351   :  { %v1722_v20 = vpop.f32.mrb[30].mxu0 }
 0x352   :  { %v712_v21 = vpack.c.bf16 %v1722_v20, %v1721_v18  ;;  %v693_v22 = vpop.f32.mrb[31].mxu0  ;;  %1734 = vmatpush3.bf16.msra.mxu1 %v710_v14 }
 0x353   :  { %v711_v23 = vpack.c.bf16 %v693_v22, %v690_v19 }
 0x355   :  { %1735 = vmatprep.subr.bf16.mxu1 %v711_v23 }
 0x356   :  { %1736 = vmatpush3.bf16.msra.mxu1 %v711_v23 }
 0x357   :  { %1737 = vmatprep.subr.bf16.mxu1 %v712_v21 }
 0x35a   :  { %1738 = vmatpush3.bf16.msra.mxu1 %v712_v21 }
 0x35d   :  { %1740 = vmatmul.mubr.bf16.vlgmr.msra.gmra.mrb[16].mxu1 %v2286_v47 }
 0x35e   :  { %1743 = vmatprep.mubr.bf16.mxu1 %v2288_v48 }
 0x365   :  { %1744 = vmatmul.mubr.bf16.gmra.mrb[20].mxu1 %v2292_v49 }
 0x366   :  { %1747 = vmatprep.mubr.bf16.mxu1 %v2294_v50 }
 0x36d   :  { %1748 = vmatmul.mubr.bf16.gmra.mrb[24].mxu1 %v2298_v51 }
 0x36e   :  { %1751 = vmatprep.mubr.bf16.mxu1 %v2300_v52 }
 0x375   :  { %1752 = vmatmul.mubr.bf16.gmra.mrb[28].mxu1 %v2304_v53 }
 0x376   :  { %1803 = vmatprep.mubr.bf16.mxu1 %v2283_v16 }
 0x430   :  { %v1741_v27 = vpop.f32.mrb[16].mxu1 }
 0x431   :  { %v763_v28 = vadd.f32 %v1741_v27, %v1480_v26  ;;  %v754_v29 = vpop.f32.mrb[17].mxu1 }
 0x432   :  { %v755_v30 = vadd.f32 %v1480_v26, %v754_v29  ;;  %v1742_v31 = vpop.f32.mrb[18].mxu1  ;;  %v1935_v29 = vld [vmem:[#allocation11 + $0x8] sm:$0xff]  }
 0x433   :  { %v766_v32 = vadd.f32 %v1742_v31, %v1480_v26  ;;  %v757_v33 = vpop.f32.mrb[19].mxu1  ;;  %v819_v35 = vmax.f32 %v763_v28, 0.0  ;;  %v1934_v28 = vld [vmem:[#allocation11] sm:$0xff]   ;;  %v1937_v31 = vld [vmem:[#allocation11 + $0x18] sm:$0xff]  }
 0x434   :  { %v758_v34 = vadd.f32 %v1480_v26, %v757_v33  ;;  %v817_v37 = vmax.f32 %v755_v30, 0.0  ;;  %1819 = vmatprep.subr.bf16.mxu0 %v1934_v28  ;;  %v1936_v30 = vld [vmem:[#allocation11 + $0x10] sm:$0xff]  }
 0x435   :  { %v820_v36 = vmax.f32 %v766_v32, 0.0  ;;  %v1939_v32 = vld [vmem:[#allocation11 + $0x28] sm:$0xff]  }
 0x436   :  { %v818_v38 = vmax.f32 %v758_v34, 0.0 }
 0x437   :  { %v834_v39 = vpack.c.bf16 %v820_v36, %v819_v35 }
 0x438   :  { %v833_v40 = vpack.c.bf16 %v818_v38, %v817_v37  ;;  %v1745_v41 = vpop.f32.mrb[20].mxu1 }
 0x439   :  { %v779_v42 = vadd.f32 %v1745_v41, %v1480_v26  ;;  %v770_v43 = vpop.f32.mrb[21].mxu1 }
 0x43a   :  { %v771_v44 = vadd.f32 %v1480_v26, %v770_v43  ;;  %v1746_v45 = vpop.f32.mrb[22].mxu1  ;;  %1771 = vmatprep.mubr.bf16.mxu0 %v833_v40 }
 0x43b   :  { %v782_v46 = vadd.f32 %v1746_v45, %v1480_v26  ;;  %v773_v54 = vpop.f32.mrb[23].mxu1  ;;  %1772 = vmatmul.mubr.bf16.vlgmr.msra.gmra.mrb[32].mxu0 %v834_v39  ;;  %v823_v57 = vmax.f32 %v779_v42, 0.0 }
 0x43c   :  { %v774_v55 = vadd.f32 %v1480_v26, %v773_v54  ;;  %v821_v59 = vmax.f32 %v771_v44, 0.0  ;;  %1820 = vmatpush3.bf16.msra.mxu0 %v1934_v28 }
 0x43d   :  { %v824_v58 = vmax.f32 %v782_v46, 0.0  ;;  %1821 = vmatprep.subr.bf16.mxu0 %v1935_v29 }
 0x43e   :  { %v822_v60 = vmax.f32 %v774_v55, 0.0 }
 0x43f   :  { %v836_v61 = vpack.c.bf16 %v824_v58, %v823_v57 }
 0x440   :  { %v835_v56 = vpack.c.bf16 %v822_v60, %v821_v59  ;;  %v1749_v62 = vpop.f32.mrb[24].mxu1  ;;  %1822 = vmatpush3.bf16.msra.mxu0 %v1935_v29 }
 0x441   :  { %v795_v63 = vadd.f32 %v1749_v62, %v1480_v26  ;;  %v786_v0 = vpop.f32.mrb[25].mxu1  ;;  %1823 = vmatprep.subr.bf16.mxu0 %v1936_v30 }
 0x442   :  { %v787_v1 = vadd.f32 %v1480_v26, %v786_v0  ;;  %v1750_v2 = vpop.f32.mrb[26].mxu1  ;;  %1775 = vmatprep.mubr.bf16.mxu0 %v835_v56  ;;  %v1940_v0 = vld [vmem:[#allocation11 + $0x30] sm:$0xff]  }
 0x443   :  { %v798_v3 = vadd.f32 %v1750_v2, %v1480_v26  ;;  %v789_v4 = vpop.f32.mrb[27].mxu1  ;;  %1776 = vmatmul.mubr.bf16.gmra.mrb[36].mxu0 %v836_v61  ;;  %v827_v6 = vmax.f32 %v795_v63, 0.0  ;;  %v1489_v2 = vld [vmem:[%s2362_s7] ss:$0 sm:$0xff] }
 0x444   :  { %v790_v5 = vadd.f32 %v1480_v26, %v789_v4  ;;  %v825_v8 = vmax.f32 %v787_v1, 0.0  ;;  %1824 = vmatpush3.bf16.msra.mxu0 %v1936_v30  ;;  %v1941_v1 = vld [vmem:[#allocation11 + $0x38] sm:$0xff]  }
 0x445   :  { %v828_v7 = vmax.f32 %v798_v3, 0.0  ;;  %1825 = vmatprep.subr.bf16.mxu0 %v1937_v31 }
 0x446   :  { %v826_v9 = vmax.f32 %v790_v5, 0.0 }
 0x447   :  { %v838_v10 = vpack.c.bf16 %v828_v7, %v827_v6 }
 0x448   :  { %v837_v11 = vpack.c.bf16 %v826_v9, %v825_v8  ;;  %v1753_v12 = vpop.f32.mrb[28].mxu1  ;;  %1826 = vmatpush3.bf16.msra.mxu0 %v1937_v31 }
 0x449   :  { %v811_v13 = vadd.f32 %v1753_v12, %v1480_v26  ;;  %v802_v14 = vpop.f32.mrb[29].mxu1 }
 0x44a   :  { %v803_v15 = vadd.f32 %v1480_v26, %v802_v14  ;;  %v1754_v17 = vpop.f32.mrb[30].mxu1  ;;  %1779 = vmatprep.mubr.bf16.mxu0 %v837_v11 }
 0x44b   :  { %v814_v18 = vadd.f32 %v1754_v17, %v1480_v26  ;;  %v805_v19 = vpop.f32.mrb[31].mxu1  ;;  %1780 = vmatmul.mubr.bf16.gmra.mrb[40].mxu0 %v838_v10  ;;  %v831_v21 = vmax.f32 %v811_v13, 0.0 }
 0x44c   :  { %v806_v20 = vadd.f32 %v1480_v26, %v805_v19  ;;  %v829_v23 = vmax.f32 %v803_v15, 0.0  ;;  %v1938_v26 = vld [vmem:[#allocation11 + $0x20] sm:$0xff]  }
 0x44d   :  { %v832_v22 = vmax.f32 %v814_v18, 0.0  ;;  %1827 = vmatprep.subr.bf16.mxu0 %v1938_v26 }
 0x44e   :  { %v830_v24 = vmax.f32 %v806_v20, 0.0  ;;  %1828 = vmatpush3.bf16.msra.mxu0 %v1938_v26 }
 0x44f   :  { %v840_v25 = vpack.c.bf16 %v832_v22, %v831_v21  ;;  %1829 = vmatprep.subr.bf16.mxu0 %v1939_v32 }
 0x450   :  { %v839_v27 = vpack.c.bf16 %v830_v24, %v829_v23 }
 0x452   :  { %1783 = vmatprep.mubr.bf16.mxu0 %v839_v27  ;;  %1830 = vmatpush3.bf16.msra.mxu0 %v1939_v32 }
 0x453   :  { %1784 = vmatmul.mubr.bf16.gmra.mrb[44].mxu0 %v840_v25  ;;  %1831 = vmatprep.subr.bf16.mxu0 %v1940_v0 }
 0x456   :  { %1832 = vmatpush3.bf16.msra.mxu0 %v1940_v0 }
 0x457   :  { %1833 = vmatprep.subr.bf16.mxu0 %v1941_v1 }
 0x45a   :  { %1834 = vmatpush3.bf16.msra.mxu0 %v1941_v1 }
 0x50e   :  { %v1773_v33 = vpop.f32.mrb[32].mxu0 }
 0x50f   :  { %v939_v34 = vpop.f32.mrb[33].mxu0 }
 0x510   :  { %v1774_v35 = vpop.f32.mrb[34].mxu0 }
 0x511   :  { %v1003_v36 = vpack.c.bf16 %v1774_v35, %v1773_v33  ;;  %v942_v37 = vpop.f32.mrb[35].mxu0 }
 0x512   :  { %v1002_v38 = vpack.c.bf16 %v942_v37, %v939_v34 }
 0x514   :  { %1787 = vmatprep.subr.bf16.mxu1 %v1002_v38 }
 0x515   :  { %1788 = vmatpush3.bf16.msra.mxu1 %v1002_v38 }
 0x516   :  { %v1777_v39 = vpop.f32.mrb[36].mxu0  ;;  %1789 = vmatprep.subr.bf16.mxu1 %v1003_v36 }
 0x517   :  { %v955_v40 = vpop.f32.mrb[37].mxu0 }
 0x518   :  { %v1778_v41 = vpop.f32.mrb[38].mxu0 }
 0x519   :  { %v1005_v42 = vpack.c.bf16 %v1778_v41, %v1777_v39  ;;  %v958_v43 = vpop.f32.mrb[39].mxu0  ;;  %1790 = vmatpush3.bf16.msra.mxu1 %v1003_v36 }
 0x51a   :  { %v1004_v44 = vpack.c.bf16 %v958_v43, %v955_v40 }
 0x51c   :  { %1791 = vmatprep.subr.bf16.mxu1 %v1004_v44 }
 0x51d   :  { %1792 = vmatpush3.bf16.msra.mxu1 %v1004_v44 }
 0x51e   :  { %v1781_v45 = vpop.f32.mrb[40].mxu0  ;;  %1793 = vmatprep.subr.bf16.mxu1 %v1005_v42 }
 0x51f   :  { %v971_v46 = vpop.f32.mrb[41].mxu0 }
 0x520   :  { %v1782_v54 = vpop.f32.mrb[42].mxu0 }
 0x521   :  { %v1007_v55 = vpack.c.bf16 %v1782_v54, %v1781_v45  ;;  %v974_v57 = vpop.f32.mrb[43].mxu0  ;;  %1794 = vmatpush3.bf16.msra.mxu1 %v1005_v42 }
 0x522   :  { %v1006_v58 = vpack.c.bf16 %v974_v57, %v971_v46 }
 0x524   :  { %1795 = vmatprep.subr.bf16.mxu1 %v1006_v58 }
 0x525   :  { %1796 = vmatpush3.bf16.msra.mxu1 %v1006_v58 }
 0x526   :  { %v1785_v59 = vpop.f32.mrb[44].mxu0  ;;  %1797 = vmatprep.subr.bf16.mxu1 %v1007_v55 }
 0x527   :  { %v987_v60 = vpop.f32.mrb[45].mxu0 }
 0x528   :  { %v1786_v61 = vpop.f32.mrb[46].mxu0 }
 0x529   :  { %v1009_v56 = vpack.c.bf16 %v1786_v61, %v1785_v59  ;;  %v990_v62 = vpop.f32.mrb[47].mxu0  ;;  %1798 = vmatpush3.bf16.msra.mxu1 %v1007_v55 }
 0x52a   :  { %v1008_v63 = vpack.c.bf16 %v990_v62, %v987_v60 }
 0x52c   :  { %1799 = vmatprep.subr.bf16.mxu1 %v1008_v63 }
 0x52d   :  { %1800 = vmatpush3.bf16.msra.mxu1 %v1008_v63 }
 0x52e   :  { %1801 = vmatprep.subr.bf16.mxu1 %v1009_v56 }
 0x531   :  { %1802 = vmatpush3.bf16.msra.mxu1 %v1009_v56 }
 0x534   :  { %1804 = vmatmul.mubr.bf16.vlgmr.msra.gmra.mrb[32].mxu1 %v2286_v47 }
 0x535   :  { %1807 = vmatprep.mubr.bf16.mxu1 %v2288_v48 }
 0x53c   :  { %1808 = vmatmul.mubr.bf16.gmra.mrb[36].mxu1 %v2292_v49 }
 0x53d   :  { %1811 = vmatprep.mubr.bf16.mxu1 %v2294_v50 }
 0x544   :  { %1812 = vmatmul.mubr.bf16.gmra.mrb[40].mxu1 %v2298_v51 }
 0x545   :  { %1815 = vmatprep.mubr.bf16.mxu1 %v2300_v52 }
 0x54c   :  { %1816 = vmatmul.mubr.bf16.gmra.mrb[44].mxu1 %v2304_v53 }
 0x54d   :  { %1867 = vmatprep.mubr.bf16.mxu1 %v2283_v16 }
 0x607   :  { %v1805_v3 = vpop.f32.mrb[32].mxu1 }
 0x608   :  { %v1060_v4 = vadd.f32 %v1805_v3, %v1489_v2  ;;  %v1051_v5 = vpop.f32.mrb[33].mxu1 }
 0x609   :  { %v1052_v6 = vadd.f32 %v1489_v2, %v1051_v5  ;;  %v1806_v7 = vpop.f32.mrb[34].mxu1 }
 0x60a   :  { %v1063_v8 = vadd.f32 %v1806_v7, %v1489_v2  ;;  %v1054_v9 = vpop.f32.mrb[35].mxu1  ;;  %v1116_v11 = vmax.f32 %v1060_v4, 0.0 }
 0x60b   :  { %v1055_v10 = vadd.f32 %v1489_v2, %v1054_v9  ;;  %v1114_v12 = vmax.f32 %v1052_v6, 0.0 }
 0x60c   :  { %v1117_v16 = vmax.f32 %v1063_v8, 0.0 }
 0x60d   :  { %v1115_v13 = vmax.f32 %v1055_v10, 0.0 }
 0x60e   :  { %v1131_v14 = vpack.c.bf16 %v1117_v16, %v1116_v11 }
 0x60f   :  { %v1130_v15 = vpack.c.bf16 %v1115_v13, %v1114_v12  ;;  %v1809_v17 = vpop.f32.mrb[36].mxu1 }
 0x610   :  { %v1076_v18 = vadd.f32 %v1809_v17, %v1489_v2  ;;  %v1067_v19 = vpop.f32.mrb[37].mxu1 }
 0x611   :  { %v1068_v20 = vadd.f32 %v1489_v2, %v1067_v19  ;;  %v1810_v21 = vpop.f32.mrb[38].mxu1  ;;  %1835 = vmatprep.mubr.bf16.mxu0 %v1130_v15 }
 0x612   :  { %v1079_v22 = vadd.f32 %v1810_v21, %v1489_v2  ;;  %v1070_v23 = vpop.f32.mrb[39].mxu1  ;;  %1836 = vmatmul.mubr.bf16.vlgmr.msra.gmra.mrb[48].mxu0 %v1131_v14  ;;  %v1120_v25 = vmax.f32 %v1076_v18, 0.0 }
 0x613   :  { %v1071_v24 = vadd.f32 %v1489_v2, %v1070_v23  ;;  %v1118_v28 = vmax.f32 %v1068_v20, 0.0 }
 0x614   :  { %v1121_v27 = vmax.f32 %v1079_v22, 0.0 }
 0x615   :  { %v1119_v29 = vmax.f32 %v1071_v24, 0.0 }
 0x616   :  { %v1133_v30 = vpack.c.bf16 %v1121_v27, %v1120_v25  ;;  %v1498_v27 = vld [vmem:[%s2364_s9] ss:$0 sm:$0xff]  ;;  %s2114_s9 = smov [#allocation13]  }
 0x617   :  { %v1132_v31 = vpack.c.bf16 %v1119_v29, %v1118_v28  ;;  %v1813_v26 = vpop.f32.mrb[40].mxu1  ;;  %s1432_s28 = sshll.u32 %s2114_s9, 4  ;;  %s1433_s28 = int_to_ptr.vmem [resolvable:$true] %s1432_s28 }
 0x618   :  { %v1092_v32 = vadd.f32 %v1813_v26, %v1489_v2  ;;  %v1083_v33 = vpop.f32.mrb[41].mxu1  ;;  %s2074_s29 = scalar_lea.vmem %s1433_s28, 2048  ;;  %p2079_p7 = scmp.lt.s32.totalorder %s1433_s28, %s1433_s28 }
 0x619   :  { %v1084_v34 = vadd.f32 %v1489_v2, %v1083_v33  ;;  %v1814_v35 = vpop.f32.mrb[42].mxu1  ;;  %1839 = vmatprep.mubr.bf16.mxu0 %v1132_v31  ;;  %p2075_p6 = scmp.ne.s32.totalorder %s1433_s28, %s2074_s29  ;;  %p2080_p8 = scmp.lt.s32.totalorder %s2074_s29, %s2074_s29 }
 0x61a   :  { %v1095_v36 = vadd.f32 %v1814_v35, %v1489_v2  ;;  %v1086_v37 = vpop.f32.mrb[43].mxu1  ;;  %1840 = vmatmul.mubr.bf16.gmra.mrb[52].mxu0 %v1133_v30  ;;  %v1124_v39 = vmax.f32 %v1092_v32, 0.0 }
 0x61b   :  { %v1087_v38 = vadd.f32 %v1489_v2, %v1086_v37  ;;  %v1122_v41 = vmax.f32 %v1084_v34, 0.0  ;;  %p2081_p9 = por %p2080_p8, %p2079_p7 }
 0x61c   :  { %v1125_v40 = vmax.f32 %v1095_v36, 0.0 }
 0x61d   :  { %v1123_v42 = vmax.f32 %v1087_v38, 0.0  ;;  %p2082_p10 = pnand %p2081_p9, %p2075_p6 }
 0x61e   :  { %v1135_v43 = vpack.c.bf16 %v1125_v40, %v1124_v39 }
 0x61f   :  { %v1134_v44 = vpack.c.bf16 %v1123_v42, %v1122_v41  ;;  %v1817_v45 = vpop.f32.mrb[44].mxu1 }
 0x620   :  { %v1108_v46 = vadd.f32 %v1817_v45, %v1489_v2  ;;  %v1099_v54 = vpop.f32.mrb[45].mxu1 }
 0x621   :  { %v1100_v55 = vadd.f32 %v1489_v2, %v1099_v54  ;;  %v1818_v57 = vpop.f32.mrb[46].mxu1  ;;  %1843 = vmatprep.mubr.bf16.mxu0 %v1134_v44 }
 0x622   :  { %v1111_v58 = vadd.f32 %v1818_v57, %v1489_v2  ;;  %v1102_v59 = vpop.f32.mrb[47].mxu1  ;;  %1844 = vmatmul.mubr.bf16.gmra.mrb[56].mxu0 %v1135_v43  ;;  %v1128_v61 = vmax.f32 %v1108_v46, 0.0 }
 0x623   :  { %v1103_v60 = vadd.f32 %v1489_v2, %v1102_v59  ;;  %v1126_v62 = vmax.f32 %v1100_v55, 0.0 }
 0x624   :  { %v1129_v56 = vmax.f32 %v1111_v58, 0.0 }
 0x625   :  { %v1127_v63 = vmax.f32 %v1103_v60, 0.0 }
 0x626   :  { %v1137_v0 = vpack.c.bf16 %v1129_v56, %v1128_v61 }
 0x627   :  { %v1136_v1 = vpack.c.bf16 %v1127_v63, %v1126_v62 }
 0x629   :  { %1847 = vmatprep.mubr.bf16.mxu0 %v1136_v1 }
 0x62a   :  { %1848 = vmatmul.mubr.bf16.gmra.mrb[60].mxu0 %v1137_v0 }
 0x6e5   :  { %v1837_v3 = vpop.f32.mrb[48].mxu0 }
 0x6e6   :  { %v1236_v4 = vpop.f32.mrb[49].mxu0 }
 0x6e7   :  { %v1838_v5 = vpop.f32.mrb[50].mxu0 }
 0x6e8   :  { %v1300_v6 = vpack.c.bf16 %v1838_v5, %v1837_v3  ;;  %v1239_v7 = vpop.f32.mrb[51].mxu0 }
 0x6e9   :  { %v1299_v8 = vpack.c.bf16 %v1239_v7, %v1236_v4 }
 0x6eb   :  { %1851 = vmatprep.subr.bf16.mxu1 %v1299_v8 }
 0x6ec   :  { %1852 = vmatpush3.bf16.msra.mxu1 %v1299_v8 }
 0x6ed   :  { %v1841_v9 = vpop.f32.mrb[52].mxu0  ;;  %1853 = vmatprep.subr.bf16.mxu1 %v1300_v6 }
 0x6ee   :  { %v1252_v10 = vpop.f32.mrb[53].mxu0 }
 0x6ef   :  { %v1842_v2 = vpop.f32.mrb[54].mxu0 }
 0x6f0   :  { %v1302_v11 = vpack.c.bf16 %v1842_v2, %v1841_v9  ;;  %v1255_v16 = vpop.f32.mrb[55].mxu0  ;;  %1854 = vmatpush3.bf16.msra.mxu1 %v1300_v6 }
 0x6f1   :  { %v1301_v12 = vpack.c.bf16 %v1255_v16, %v1252_v10 }
 0x6f3   :  { %1855 = vmatprep.subr.bf16.mxu1 %v1301_v12 }
 0x6f4   :  { %1856 = vmatpush3.bf16.msra.mxu1 %v1301_v12 }
 0x6f5   :  { %v1845_v13 = vpop.f32.mrb[56].mxu0  ;;  %1857 = vmatprep.subr.bf16.mxu1 %v1302_v11 }
 0x6f6   :  { %v1268_v14 = vpop.f32.mrb[57].mxu0 }
 0x6f7   :  { %v1846_v15 = vpop.f32.mrb[58].mxu0 }
 0x6f8   :  { %v1304_v17 = vpack.c.bf16 %v1846_v15, %v1845_v13  ;;  %v1271_v18 = vpop.f32.mrb[59].mxu0  ;;  %1858 = vmatpush3.bf16.msra.mxu1 %v1302_v11 }
 0x6f9   :  { %v1303_v19 = vpack.c.bf16 %v1271_v18, %v1268_v14 }
 0x6fb   :  { %1859 = vmatprep.subr.bf16.mxu1 %v1303_v19 }
 0x6fc   :  { %1860 = vmatpush3.bf16.msra.mxu1 %v1303_v19 }
 0x6fd   :  { %v1849_v20 = vpop.f32.mrb[60].mxu0  ;;  %1861 = vmatprep.subr.bf16.mxu1 %v1304_v17 }
 0x6fe   :  { %v1284_v21 = vpop.f32.mrb[61].mxu0 }
 0x6ff   :  { %v1850_v22 = vpop.f32.mrb[62].mxu0 }
 0x700   :  { %v1306_v23 = vpack.c.bf16 %v1850_v22, %v1849_v20  ;;  %v1287_v24 = vpop.f32.mrb[63].mxu0  ;;  %1862 = vmatpush3.bf16.msra.mxu1 %v1304_v17 }
 0x701   :  { %v1305_v25 = vpack.c.bf16 %v1287_v24, %v1284_v21 }
 0x703   :  { %1863 = vmatprep.subr.bf16.mxu1 %v1305_v25 }
 0x704   :  { %1864 = vmatpush3.bf16.msra.mxu1 %v1305_v25 }
 0x705   :  { %1865 = vmatprep.subr.bf16.mxu1 %v1306_v23 }
 0x708   :  { %1866 = vmatpush3.bf16.msra.mxu1 %v1306_v23 }
 0x70b   :  { %1868 = vmatmul.mubr.bf16.vlgmr.msra.gmra.mrb[48].mxu1 %v2286_v47 }
 0x70c   :  { %1871 = vmatprep.mubr.bf16.mxu1 %v2288_v48 }
 0x713   :  { %1872 = vmatmul.mubr.bf16.gmra.mrb[52].mxu1 %v2292_v49 }
 0x714   :  { %1875 = vmatprep.mubr.bf16.mxu1 %v2294_v50 }
 0x71b   :  { %1876 = vmatmul.mubr.bf16.gmra.mrb[56].mxu1 %v2298_v51 }
 0x71c   :  { %1879 = vmatprep.mubr.bf16.mxu1 %v2300_v52 }
 0x723   :  { %1880 = vmatmul.mubr.bf16.gmra.mrb[60].mxu1 %v2304_v53 }
 0x7de   :  { %v1869_v28 = vpop.f32.mrb[48].mxu1 }
 0x7df   :  { %v1357_v29 = vadd.f32 %v1869_v28, %v1498_v27  ;;  %v1348_v30 = vpop.f32.mrb[49].mxu1 }
 0x7e0   :  { %v1349_v47 = vadd.f32 %v1498_v27, %v1348_v30  ;;  %v1870_v31 = vpop.f32.mrb[50].mxu1 }
 0x7e1   :  { %1413 = vst [vmem:[#allocation13 + $0x10] sm:$0xff] %v1357_v29  ;;  %v1360_v48 = vadd.f32 %v1870_v31, %v1498_v27  ;;  %v1351_v49 = vpop.f32.mrb[51].mxu1 }
 0x7e2   :  { %1411 = vst [vmem:[#allocation13] sm:$0xff] %v1349_v47  ;;  %v1352_v50 = vadd.f32 %v1498_v27, %v1351_v49 }
 0x7e3   :  { %1414 = vst [vmem:[#allocation13 + $0x18] sm:$0xff] %v1360_v48 }
 0x7e4   :  { %1412 = vst [vmem:[#allocation13 + $0x8] sm:$0xff] %v1352_v50 }
 0x7e6   :  { %v1873_v51 = vpop.f32.mrb[52].mxu1 }
 0x7e7   :  { %v1373_v52 = vadd.f32 %v1873_v51, %v1498_v27  ;;  %v1364_v26 = vpop.f32.mrb[53].mxu1 }
 0x7e8   :  { %v1365_v53 = vadd.f32 %v1498_v27, %v1364_v26  ;;  %v1874_v32 = vpop.f32.mrb[54].mxu1 }
 0x7e9   :  { %1417 = vst [vmem:[#allocation13 + $0x30] sm:$0xff] %v1373_v52  ;;  %v1376_v33 = vadd.f32 %v1874_v32, %v1498_v27  ;;  %v1367_v34 = vpop.f32.mrb[55].mxu1 }
 0x7ea   :  { %1415 = vst [vmem:[#allocation13 + $0x20] sm:$0xff] %v1365_v53  ;;  %v1368_v35 = vadd.f32 %v1498_v27, %v1367_v34 }
 0x7eb   :  { %1418 = vst [vmem:[#allocation13 + $0x38] sm:$0xff] %v1376_v33 }
 0x7ec   :  { %1416 = vst [vmem:[#allocation13 + $0x28] sm:$0xff] %v1368_v35 }
 0x7ee   :  { %v1877_v36 = vpop.f32.mrb[56].mxu1 }
 0x7ef   :  { %v1389_v37 = vadd.f32 %v1877_v36, %v1498_v27  ;;  %v1380_v38 = vpop.f32.mrb[57].mxu1 }
 0x7f0   :  { %v1381_v39 = vadd.f32 %v1498_v27, %v1380_v38  ;;  %v1878_v40 = vpop.f32.mrb[58].mxu1 }
 0x7f1   :  { %1421 = vst [vmem:[#allocation13 + $0x50] sm:$0xff] %v1389_v37  ;;  %v1392_v41 = vadd.f32 %v1878_v40, %v1498_v27  ;;  %v1383_v42 = vpop.f32.mrb[59].mxu1 }
 0x7f2   :  { %1419 = vst [vmem:[#allocation13 + $0x40] sm:$0xff] %v1381_v39  ;;  %v1384_v43 = vadd.f32 %v1498_v27, %v1383_v42 }
 0x7f3   :  { %1422 = vst [vmem:[#allocation13 + $0x58] sm:$0xff] %v1392_v41 }
 0x7f4   :  { %1420 = vst [vmem:[#allocation13 + $0x48] sm:$0xff] %v1384_v43 }
 0x7f6   :  { %v1881_v44 = vpop.f32.mrb[60].mxu1 }
 0x7f7   :  { %v1405_v45 = vadd.f32 %v1881_v44, %v1498_v27  ;;  %v1396_v46 = vpop.f32.mrb[61].mxu1 }
 0x7f8   :  { %v1397_v54 = vadd.f32 %v1498_v27, %v1396_v46  ;;  %v1882_v55 = vpop.f32.mrb[62].mxu1 }
 0x7f9   :  { %1425 = vst [vmem:[#allocation13 + $0x70] sm:$0xff] %v1405_v45  ;;  %v1408_v57 = vadd.f32 %v1882_v55, %v1498_v27  ;;  %v1399_v58 = vpop.f32.mrb[63].mxu1 }
 0x7fa   :  { %1423 = vst [vmem:[#allocation13 + $0x60] sm:$0xff] %v1397_v54  ;;  %v1400_v59 = vadd.f32 %v1498_v27, %v1399_v58 }
 0x7fb   :  { %1426 = vst [vmem:[#allocation13 + $0x78] sm:$0xff] %v1408_v57 }
 0x7fc   :  { %1424 = vst [vmem:[#allocation13 + $0x68] sm:$0xff] %v1400_v59 }
 0x7fd   :  { %2085 = shalt.err (!%p2082_p10)
}
 0x7fe   :  { %s2086_s4 = scalar_lea.hbm %s2365_s10, 2048 }
 0x7ff   :  { %p2087_p11 = scmp.ne.s32.totalorder %s2365_s10, %s2086_s4  ;;  %p2090_p12 = scmp.lt.u32.totalorder %s2086_s4, %s2365_s10 }
 0x801   :  { %p2092_p13 = pnand %p2090_p12, %p2087_p11 }
 0x803   :  { %2095 = shalt.err (!%p2092_p13)
}
 0x804   :  { %s2115_s22 = smov 128   ;;  %s2116_s15 = smov 8  }
 0x805   :  { %1438 = dma.vmem_to_hbm [thread:$0]  %s1433_s28, 2048, %s2365_s10, [#allocation4], %s2115_s22, %s2115_s22, %s2116_s15  }
 0x806   :  { %2104 = dma.done.wait [#allocation4], 2048  }
 0x807   :  { %2105 = vsyncadd [#allocation4], 4294965248 }
 0x808   :  { %1442 = vsyncpa [#allocation3], 1 }
 0x809   :  { %1443 = vsyncpa [#allocation6], 1 }
 0x80a   :  { %1444 = vsyncpa [#allocation9], 1 }
 0x80b   :  { %1445 = vsyncpa [#allocation12], 1 }
 0x80c   :  { %1446 = vsyncpa [#allocation4], 1 }

</bundles_post_ra>
